<compile_context>
chip_gen: v7x
topology: tpu7x:2x2x1
jax: 0.10.0
libtpu: 0.0.40
codegen_flags: <defaults>
</compile_context>

<pallas_src>
import functools

import jax
import jax.numpy as jnp
from jax import lax
from jax.experimental import pallas as pl
from jax.experimental.pallas import tpu as pltpu


# ---------------------------------------------------------------------------
# wrapper-side helpers
# ---------------------------------------------------------------------------
def _pick_tile(total, candidates):
    """Largest candidate that evenly divides `total`, else the full extent."""
    for c in candidates:
        if total >= c and total % c == 0:
            return c
    return total


def _interp_matrix(out_size, in_size):
    """1-D bilinear interpolation matrix, align_corners=True. Shape (out, in)."""
    if in_size == 1:
        return jnp.ones((out_size, 1), jnp.float32)
    if out_size == 1:
        # PyTorch align_corners=True with output size 1 samples index 0.
        return jnp.zeros((1, in_size), jnp.float32).at[0, 0].set(1.0)
    i = jnp.arange(out_size, dtype=jnp.float32)
    src = i * (in_size - 1) / (out_size - 1)
    lo = jnp.floor(src)
    frac = src - lo
    lo_i = lo.astype(jnp.int32)
    hi_i = jnp.minimum(lo_i + 1, in_size - 1)
    cols = jnp.arange(in_size)[None, :]
    return ((cols == lo_i[:, None]).astype(jnp.float32) * (1.0 - frac)[:, None]
            + (cols == hi_i[:, None]).astype(jnp.float32) * frac[:, None])


def _mosaic_params(semantics, est_bytes):
    """Explicit per-call VMEM budget (review item), clamped to be safe on v7x."""
    limit = int(min(max(2 * est_bytes, 32 * 2**20), 60 * 2**20))
    return pltpu.CompilerParams(dimension_semantics=semantics,
                                vmem_limit_bytes=limit)


# ---------------------------------------------------------------------------
# Kernel 1: high-branch channel fold on the LOW-resolution grid
#           (down_h + all 9 flow-conv taps folded into an (18, C) weight slab)
# ---------------------------------------------------------------------------
def _fold_kernel(x_ref, w_ref, o_ref):
    k = pl.program_id(1)

    @pl.when(k == 0)
    def _():
        o_ref[...] = jnp.zeros_like(o_ref)

    o_ref[0] += jnp.dot(w_ref[0], x_ref[0], preferred_element_type=jnp.float32)


def fold_high_channels(hi_flat_bf16, w_stacked):
    """hi: (N, C, h*w) bf16, w: (nk, 18, tc) bf16 -> (N, 18, h*w) f32."""
    n, _, hw_in = hi_flat_bf16.shape
    nk, c18, tc = w_stacked.shape
    est = 2 * (tc * hw_in * 2 + c18 * hw_in * 4) + c18 * tc * 2
    return pl.pallas_call(
        _fold_kernel,
        grid=(n, nk),
        in_specs=[
            pl.BlockSpec((1, tc, hw_in), lambda i, k: (i, k, 0)),
            pl.BlockSpec((1, c18, tc), lambda i, k: (k, 0, 0)),
        ],
        out_specs=pl.BlockSpec((1, c18, hw_in), lambda i, k: (i, 0, 0)),
        out_shape=jax.ShapeDtypeStruct((n, c18, hw_in), jnp.float32),
        compiler_params=_mosaic_params(("parallel", "arbitrary"), est),
    )(hi_flat_bf16, w_stacked)


# ---------------------------------------------------------------------------
# Kernel 2: separable bilinear upsample (align_corners=True) of the 18 folded
#           tap channels only (no C-channel upsample, no C-sized Ay broadcast)
# ---------------------------------------------------------------------------
def _up18_kernel(x_ref, ay_ref, axt_ref, o_ref):
    _, c18, h, w = x_ref.shape
    th, big_w = o_ref.shape[2], o_ref.shape[3]
    x = x_ref[0]                                                 # (18, h, w)
    xw = jnp.dot(x.reshape(c18 * h, w).astype(jnp.bfloat16), axt_ref[...],
                 preferred_element_type=jnp.float32)             # (18*h, W)
    xw = xw.reshape(c18, h, big_w).astype(jnp.bfloat16)          # (18, h, W)
    ayb = jnp.broadcast_to(ay_ref[...][None, :, :], (c18, th, h))
    out = lax.dot_general(
        ayb, xw,
        dimension_numbers=(((2,), (1,)), ((0,), (0,))),
        preferred_element_type=jnp.float32)                      # (18, TH, W)
    o_ref[0] = out


def upsample18(y18_f32, ay_bf16, axt_bf16):
    """y18: (N, 18, h, w) f32 -> (N, 18, H, W) f32."""
    n, c18, h, w = y18_f32.shape
    out_h, out_w = ay_bf16.shape[0], axt_bf16.shape[1]
    th = _pick_tile(out_h, (64, 32, 16, 8))
    est = 2 * (c18 * h * w * 4 + c18 * th * out_w * 4) + 4 * c18 * th * out_w
    return pl.pallas_call(
        _up18_kernel,
        grid=(n, out_h // th),
        in_specs=[
            pl.BlockSpec((1, c18, h, w), lambda i, t: (i, 0, 0, 0)),
            pl.BlockSpec((th, h), lambda i, t: (t, 0)),
            pl.BlockSpec((w, out_w), lambda i, t: (0, 0)),
        ],
        out_specs=pl.BlockSpec((1, c18, th, out_w), lambda i, t: (i, 0, t, 0)),
        out_shape=jax.ShapeDtypeStruct((n, c18, out_h, out_w), jnp.float32),
        compiler_params=_mosaic_params(("parallel", "parallel"), est),
    )(y18_f32, ay_bf16, axt_bf16)


# ---------------------------------------------------------------------------
# Kernel 3: fused flow conv (low-branch channel reduction + tap assembly)
# ---------------------------------------------------------------------------
def _shift_lanes(x, s):
    """out[:, p] = x[:, p + s], zero-filled outside [0, length)."""
    rows, length = x.shape
    if s == 0:
        return x
    if abs(s) >= length:
        return jnp.zeros_like(x)
    if s > 0:
        return jnp.concatenate([x[:, s:], jnp.zeros((rows, s), x.dtype)], axis=1)
    return jnp.concatenate([jnp.zeros((rows, -s), x.dtype), x[:, :length + s]],
                           axis=1)


def _flow_kernel(col_ref, yh_ref, lo_ref, wl_ref, o_ref, ys_ref, *, out_w):
    # col: (1, HW) int32; yh: (1, 18, HW) f32 (upsampled high taps);
    # lo: (1, tc, HW) bf16; wl: (1, 18, tc) bf16; o: (1, 2, HW) f32;
    # ys scratch: (18, HW) f32 accumulated over the channel grid axis.
    k = pl.program_id(1)
    nk = pl.num_programs(1)
    contrib = jnp.dot(wl_ref[0], lo_ref[0], preferred_element_type=jnp.float32)

    @pl.when(k == 0)
    def _():
        ys_ref[...] = yh_ref[0] + contrib

    @pl.when(k > 0)
    def _():
        ys_ref[...] = ys_ref[...] + contrib

    @pl.when(k == nk - 1)
    def _():
        ys = ys_ref[...]                                  # (18, HW)
        col = col_ref[...]                                # (1, HW) int32
        hw = ys.shape[1]
        acc = jnp.zeros((2, hw), jnp.float32)
        for ky in range(3):
            for kx in range(3):
                dy, dx = ky - 1, kx - 1
                tap = ky * 3 + kx
                # shift the 2-row tap result, not the tc-row activations
                t = _shift_lanes(ys[2 * tap:2 * tap + 2, :], dy * out_w + dx)
                if dx != 0:
                    valid = (col + dx >= 0) & (col + dx <= out_w - 1)
                    t = jnp.where(valid, t, 0.0)
                acc = acc + t
        o_ref[0] = acc


def flow_make(col_ids, yh_up_flat, lo_flat_bf16, wl_stacked, out_w):
    """Returns the 2-channel flow field, shape (N, 2, H*W) float32."""
    # TODO(synk): add a row-tiled (halo'd) spatial grid axis so v7x's second
    # TensorCore is used at batch 1; channel axis here is a reduction.
    n, c18, hw = yh_up_flat.shape
    nk, _, tc = wl_stacked.shape
    est = (2 * tc * hw * 2 + c18 * hw * 4 + 2 * 2 * hw * 4
           + c18 * hw * 4 + hw * 4)
    kern = functools.partial(_flow_kernel, out_w=out_w)
    return pl.pallas_call(
        kern,
        grid=(n, nk),
        in_specs=[
            pl.BlockSpec((1, hw), lambda i, k: (0, 0)),
            pl.BlockSpec((1, c18, hw), lambda i, k: (i, 0, 0)),
            pl.BlockSpec((1, tc, hw), lambda i, k: (i, k, 0)),
            pl.BlockSpec((1, c18, tc), lambda i, k: (k, 0, 0)),
        ],
        out_specs=pl.BlockSpec((1, 2, hw), lambda i, k: (i, 0, 0)),
        out_shape=jax.ShapeDtypeStruct((n, 2, hw), jnp.float32),
        scratch_shapes=[pltpu.VMEM((c18, hw), jnp.float32)],
        compiler_params=_mosaic_params(("parallel", "arbitrary"), est),
    )(col_ids, yh_up_flat, lo_flat_bf16, wl_stacked)


# ---------------------------------------------------------------------------
# Kernel 4: flow_warp == grid_sample(bilinear, zeros, align_corners=False)
#           separable one-hot sampling weights contracted on the MXU
# ---------------------------------------------------------------------------
def _warp_kernel(src_ref, flow_ref, base_ref, ids_ref, o_ref, *,
                 src_h, src_w, out_h, out_w):
    # src: (1, C, hw_in) bf16; flow: (1, 2, tile) f32; base: (2, tile) f32;
    # ids: (hw_in, 2) int32 [row, col of every source pixel]; o: (1, C, tile).
    del out_w  # kept for symmetry with the reference quirk below
    tile = o_ref.shape[2]
    fx = flow_ref[0, 0:1, :]
    fy = flow_ref[0, 1:2, :]
    bx = base_ref[0:1, :]
    by = base_ref[1:2, :]
    # Reference quirk reproduced verbatim: norm = [[[[H, W]]]] while the grid
    # channel order is (x, y) => x-flow is divided by H and y-flow by W.
    gx = bx + fx * (1.0 / out_h)
    gy = by + fy * (1.0 / o_ref_norm_w)
    # grid_sample unnormalization (align_corners=False) w.r.t. source (h, w)
    sx = (gx + 1.0) * (0.5 * src_w) - 0.5
    sy = (gy + 1.0) * (0.5 * src_h) - 0.5
    x0 = jnp.floor(sx)
    y0 = jnp.floor(sy)
    wx1 = sx - x0
    wy1 = sy - y0
    x0i = x0.astype(jnp.int32)
    y0i = y0.astype(jnp.int32)

    row_ids = ids_ref[:, 0:1]                            # (hw_in, 1) int32
    col_ids = ids_ref[:, 1:2]
    # Separable bilinear weights: equality against the (always in-range) source
    # row/col ids realises the zeros padding for free (no validity masks, no
    # (hw_in, tile) int32 iota).
    ry = (jnp.where(row_ids == y0i, 1.0 - wy1, 0.0)
          + jnp.where(row_ids == y0i + 1, wy1, 0.0))     # (hw_in, tile)
    cx = (jnp.where(col_ids == x0i, 1.0 - wx1, 0.0)
          + jnp.where(col_ids == x0i + 1, wx1, 0.0))     # (hw_in, tile)
    m = (ry * cx).astype(jnp.bfloat16)
    # TODO(synk): swap the one-hot MXU contraction for a true per-tap dynamic
    # lane gather (jnp.take on the VMEM-resident source) once its Mosaic
    # lowering is guaranteed for arbitrary (C, hw_in) operands.
    out = jnp.dot(src_ref[0], m, preferred_element_type=jnp.float32)
    o_ref[0] = out


# the "norm" quirk uses (H, W); keep W reachable as a module constant via
# functools.partial below (set per call).
o_ref_norm_w = None  # placeholder, replaced by partial binding


def flow_warp(src_flat_bf16, flow_flat, base, src_ids, src_h, src_w,
              out_h, out_w):
    n, c1, hw_in = src_flat_bf16.shape
    hw_out = out_h * out_w
    tile = None
    budget = 12 * 2**20                       # keep m + temporaries v7x-friendly
    for cand in (512, 256, 128):
        if hw_out % cand == 0 and 6 * hw_in * cand <= budget:
            tile = cand
            break
    if tile is None:
        tile = _pick_tile(hw_out, (512, 256, 128))
    est = (2 * c1 * hw_in * 2 + 2 * 2 * tile * 4 + 2 * c1 * tile * 4
           + 10 * hw_in * tile)
    kern = functools.partial(_warp_kernel_bound, src_h=src_h, src_w=src_w,
                             out_h=out_h, out_w=out_w)
    return pl.pallas_call(
        kern,
        grid=(n, hw_out // tile),
        in_specs=[
            pl.BlockSpec((1, c1, hw_in), lambda i, t: (i, 0, 0)),
            pl.BlockSpec((1, 2, tile), lambda i, t: (i, 0, t)),
            pl.BlockSpec((2, tile), lambda i, t: (0, t)),
            pl.BlockSpec((hw_in, 2), lambda i, t: (0, 0)),
        ],
        out_specs=pl.BlockSpec((1, c1, tile), lambda i, t: (i, 0, t)),
        out_shape=jax.ShapeDtypeStruct((n, c1, hw_out), jnp.float32),
        compiler_params=_mosaic_params(("parallel", "parallel"), est),
    )(src_flat_bf16, flow_flat, base, src_ids)


def _warp_kernel_bound(src_ref, flow_ref, base_ref, ids_ref, o_ref, *,
                       src_h, src_w, out_h, out_w):
    """Same as _warp_kernel but with the norm constants bound explicitly."""
    tile = o_ref.shape[2]
    fx = flow_ref[0, 0:1, :]
    fy = flow_ref[0, 1:2, :]
    bx = base_ref[0:1, :]
    by = base_ref[1:2, :]
    gx = bx + fx * (1.0 / out_h)          # x-flow / H  (reference quirk)
    gy = by + fy * (1.0 / out_w)          # y-flow / W
    sx = (gx + 1.0) * (0.5 * src_w) - 0.5
    sy = (gy + 1.0) * (0.5 * src_h) - 0.5
    x0 = jnp.floor(sx)
    y0 = jnp.floor(sy)
    wx1 = sx - x0
    wy1 = sy - y0
    x0i = x0.astype(jnp.int32)
    y0i = y0.astype(jnp.int32)
    row_ids = ids_ref[:, 0:1]
    col_ids = ids_ref[:, 1:2]
    ry = (jnp.where(row_ids == y0i, 1.0 - wy1, 0.0)
          + jnp.where(row_ids == y0i + 1, wy1, 0.0))
    cx = (jnp.where(col_ids == x0i, 1.0 - wx1, 0.0)
          + jnp.where(col_ids == x0i + 1, wx1, 0.0))
    m = (ry * cx).astype(jnp.bfloat16)
    out = jnp.dot(src_ref[0], m, preferred_element_type=jnp.float32)
    del tile
    o_ref[0] = out


# ---------------------------------------------------------------------------
# Full AlignedModule forward
# ---------------------------------------------------------------------------
def aligned_module(low_nchw, high_nchw, w_down_l, w_down_h, w_flow):
    """
    low_nchw : (N, c1, H, W) f32   -- high-resolution, low-level feature
    high_nchw: (N, c1, h, w) f32   -- low-resolution, high-level feature
    w_down_l : (c2, c1)            1x1 conv weight, PyTorch (out, in)
    w_down_h : (c2, c1)
    w_flow   : (2, 2*c2, 3, 3)     3x3 conv weight, PyTorch (out, in, kh, kw);
                                   input-channel order = [high, low]
    returns  : (N, c1, H, W) f32
    """
    n, c1, out_h, out_w = low_nchw.shape
    _, _, src_h, src_w = high_nchw.shape
    c2 = w_down_l.shape[0]
    hw_out = out_h * out_w
    hw_in = src_h * src_w

    # Fold both 1x1 convs into the 3x3 conv and stack the 9 taps: (18, c1) slabs
    wh = jnp.einsum("omyx,mi->yxoi", w_flow[:, :c2], w_down_h).reshape(18, c1)
    wl = jnp.einsum("omyx,mi->yxoi", w_flow[:, c2:], w_down_l).reshape(18, c1)
    tc = _pick_tile(c1, (64, 32, 16, 8))       # cap 64 for v7x's 64 MiB VMEM
    nk = c1 // tc
    wh_t = wh.reshape(18, nk, tc).transpose(1, 0, 2).astype(jnp.bfloat16)
    wl_t = wl.reshape(18, nk, tc).transpose(1, 0, 2).astype(jnp.bfloat16)

    ay = _interp_matrix(out_h, src_h)                   # (H, h)
    axt = _interp_matrix(out_w, src_w).T                # (w, W)

    hi_flat = high_nchw.reshape(n, c1, hw_in).astype(jnp.bfloat16)
    lo_flat = low_nchw.reshape(n, c1, hw_out).astype(jnp.bfloat16)

    # high-branch channel fold on the low-res grid, then upsample only 18 ch.
    y18 = fold_high_channels(hi_flat, wh_t)             # (n, 18, h*w) f32
    y18 = y18.reshape(n, 18, src_h, src_w)
    yh_up = upsample18(y18, ay.astype(jnp.bfloat16), axt.astype(jnp.bfloat16))
    yh_up = yh_up.reshape(n, 18, hw_out)                # free HBM reshape

    # exact int32 column ids for the flow conv's horizontal padding masks
    col_ids = (jnp.arange(hw_out, dtype=jnp.int32) % out_w).reshape(1, hw_out)
    flow = flow_make(col_ids, yh_up, lo_flat, wl_t, out_w)   # (n, 2, H*W) f32

    # precomputed normalized base grid + exact int32 source row/col ids
    bx = -1.0 + 2.0 * jnp.arange(out_w, dtype=jnp.float32) / max(out_w - 1, 1)
    by = -1.0 + 2.0 * jnp.arange(out_h, dtype=jnp.float32) / max(out_h - 1, 1)
    base = jnp.stack([jnp.tile(bx, out_h), jnp.repeat(by, out_w)], axis=0)
    src_ids = jnp.stack(
        [jnp.arange(hw_in, dtype=jnp.int32) // src_w,
         jnp.arange(hw_in, dtype=jnp.int32) % src_w], axis=1)   # (hw_in, 2)

    warped = flow_warp(hi_flat, flow, base, src_ids,
                       src_h, src_w, out_h, out_w)       # (n, c1, H*W)
    return warped.reshape(n, c1, out_h, out_w)


# ---------------------------------------------------------------------------
# Pure-JAX reference of the PyTorch module (for numerical validation)
# ---------------------------------------------------------------------------
def aligned_module_reference(low, high, w_down_l, w_down_h, w_flow):
    n, c1, out_h, out_w = low.shape
    _, _, src_h, src_w = high.shape
    c2 = w_down_l.shape[0]
    low_d = jnp.einsum("oc,nchw->nohw", w_down_l, low)
    high_d = jnp.einsum("oc,nchw->nohw", w_down_h, high)
    ay = _interp_matrix(out_h, src_h)
    ax = _interp_matrix(out_w, src_w)
    high_up = jnp.einsum("Yy,Xx,ncyx->ncYX", ay, ax, high_d)
    cat = jnp.concatenate([high_up, low_d], axis=1)
    flow = lax.conv_general_dilated(
        cat, w_flow, window_strides=(1, 1), padding=((1, 1), (1, 1)),
        dimension_numbers=("NCHW", "OIHW", "NCHW"))
    bx = -1.0 + 2.0 * jnp.arange(out_w, dtype=jnp.float32) / max(out_w - 1, 1)
    by = -1.0 + 2.0 * jnp.arange(out_h, dtype=jnp.float32) / max(out_h - 1, 1)
    gx = jnp.broadcast_to(bx[None, :], (out_h, out_w))[None] + flow[:, 0] / out_h
    gy = jnp.broadcast_to(by[:, None], (out_h, out_w))[None] + flow[:, 1] / out_w
    sx = (gx + 1.0) * (0.5 * src_w) - 0.5
    sy = (gy + 1.0) * (0.5 * src_h) - 0.5
    x0 = jnp.floor(sx)
    y0 = jnp.floor(sy)
    wx1 = sx - x0
    wy1 = sy - y0
    srcf = high.reshape(n, c1, src_h * src_w)
    out = jnp.zeros((n, c1, out_h * out_w), jnp.float32)
    for yc, xc, wt in ((y0, x0, (1 - wy1) * (1 - wx1)),
                       (y0, x0 + 1, (1 - wy1) * wx1),
                       (y0 + 1, x0, wy1 * (1 - wx1)),
                       (y0 + 1, x0 + 1, wy1 * wx1)):
        valid = ((xc >= 0) & (xc <= src_w - 1) & (yc >= 0) & (yc <= src_h - 1))
        xi = jnp.clip(xc, 0, src_w - 1).astype(jnp.int32)
        yi = jnp.clip(yc, 0, src_h - 1).astype(jnp.int32)
        idx = (yi * src_w + xi).reshape(n, 1, out_h * out_w)
        g = jnp.take_along_axis(
            srcf, jnp.broadcast_to(idx, (n, c1, out_h * out_w)), axis=2)
        out = out + g * (wt * valid).reshape(n, 1, out_h * out_w)
    return out.reshape(n, c1, out_h, out_w)


if __name__ == "__main__":
    key = jax.random.PRNGKey(0)
    n, c1, c2 = 2, 4, 8
    out_h, out_w = 16, 24        # low_feature (output) spatial size, non-square
    src_h, src_w = 8, 12         # high_feature spatial size

    k0, k1, k2, k3, k4 = jax.random.split(key, 5)
    low_feature = jax.random.normal(k0, (n, c1, out_h, out_w), jnp.float32)
    high_feature = jax.random.normal(k1, (n, c1, src_h, src_w), jnp.float32)
    w_down_l = 0.1 * jax.random.normal(k2, (c2, c1), jnp.float32)
    w_down_h = 0.1 * jax.random.normal(k3, (c2, c1), jnp.float32)
    w_flow = 0.1 * jax.random.normal(k4, (2, 2 * c2, 3, 3), jnp.float32)

    out = aligned_module(low_feature, high_feature, w_down_l, w_down_h, w_flow)
    out = jax.block_until_ready(out)

    assert out.shape == (n, c1, out_h, out_w), out.shape
    assert bool(jnp.all(jnp.isfinite(out)))

    ref = aligned_module_reference(low_feature, high_feature,
                                   w_down_l, w_down_h, w_flow)
    err = float(jnp.max(jnp.abs(out - ref)))
    assert err < 5e-2, f"max abs error vs reference: {err}"
    print("KERNEL_OK")
</pallas_src>

<mosaic_0001>
module attributes {stable_mosaic.version = 11 : i64} {
  func.func @_fold_kernel(%arg0: i32, %arg1: i32, %arg2: memref<1x4x96xbf16, #tpu.memory_space<vmem>>, %arg3: memref<1x18x4xbf16, #tpu.memory_space<vmem>>, %arg4: memref<1x18x96xf32, #tpu.memory_space<vmem>>) attributes {dimension_semantics = [#tpu.dimension_semantics<parallel>, #tpu.dimension_semantics<arbitrary>], iteration_bounds = array<i64: 2, 1>, scalar_prefetch = 0 : i64, scratch_operands = 0 : i64, tpu.core_type = #tpu.core_type<tc>, window_params = [{transform_indices = @transform_0, window_bounds = array<i64: 1, 4, 96>}, {transform_indices = @transform_1, window_bounds = array<i64: 1, 18, 4>}, {transform_indices = @transform_2, window_bounds = array<i64: 1, 18, 96>}]} {
    %c0_i32 = arith.constant 0 : i32
    %0 = arith.cmpi eq, %arg1, %c0_i32 : i32
    %1 = arith.extui %0 : i1 to i32
    %c0_i32_0 = arith.constant 0 : i32
    %2 = arith.cmpi ne, %1, %c0_i32_0 : i32
    scf.if %2 {
      %cst_12 = arith.constant 0.000000e+00 : f32
      %14 = vector.broadcast %cst_12 : f32 to vector<1x18x96xf32>
      %c0_13 = arith.constant 0 : index
      %c0_14 = arith.constant 0 : index
      %c0_15 = arith.constant 0 : index
      %15 = vector.load %arg4[%c0_13, %c0_14, %c0_15] : memref<1x18x96xf32, #tpu.memory_space<vmem>>, vector<1x18x96xf32>
      tpu.vector_store %arg4[%c0_13, %c0_14, %c0_15], %14 {strides = array<i32>} : memref<1x18x96xf32, #tpu.memory_space<vmem>>, vector<1x18x96xf32>,
    } else {
    }
    %c0 = arith.constant 0 : index
    %c0_1 = arith.constant 0 : index
    %c0_2 = arith.constant 0 : index
    %3 = vector.load %arg4[%c0, %c0_1, %c0_2] : memref<1x18x96xf32, #tpu.memory_space<vmem>>, vector<1x18x96xf32>
    %4 = vector.shape_cast %3 : vector<1x18x96xf32> to vector<18x96xf32>
    %c0_3 = arith.constant 0 : index
    %c0_4 = arith.constant 0 : index
    %c0_5 = arith.constant 0 : index
    %5 = vector.load %arg3[%c0_3, %c0_4, %c0_5] : memref<1x18x4xbf16, #tpu.memory_space<vmem>>, vector<1x18x4xbf16>
    %6 = vector.shape_cast %5 : vector<1x18x4xbf16> to vector<18x4xbf16>
    %c0_6 = arith.constant 0 : index
    %c0_7 = arith.constant 0 : index
    %c0_8 = arith.constant 0 : index
    %7 = vector.load %arg2[%c0_6, %c0_7, %c0_8] : memref<1x4x96xbf16, #tpu.memory_space<vmem>>, vector<1x4x96xbf16>
    %8 = vector.shape_cast %7 : vector<1x4x96xbf16> to vector<4x96xbf16>
    %cst = arith.constant dense<0.000000e+00> : vector<18x96xf32>
    %9 = tpu.matmul %6, %8, %cst {dimension_numbers = #tpu.dot_dimension_numbers<[1], [0], [0], [1], [0, 0, 1, 1], [], []>} : vector<18x4xbf16>, vector<4x96xbf16>, vector<18x96xf32> -> vector<18x96xf32>
    %10 = arith.addf %4, %9 : vector<18x96xf32>
    %c0_9 = arith.constant 0 : index
    %c0_10 = arith.constant 0 : index
    %c0_11 = arith.constant 0 : index
    %11 = vector.load %arg4[%c0_9, %c0_10, %c0_11] : memref<1x18x96xf32, #tpu.memory_space<vmem>>, vector<1x18x96xf32>
    %12 = vector.shape_cast %11 : vector<1x18x96xf32> to vector<18x96xf32>
    %13 = vector.shape_cast %10 : vector<18x96xf32> to vector<1x18x96xf32>
    tpu.vector_store %arg4[%c0_9, %c0_10, %c0_11], %13 {strides = array<i32>} : memref<1x18x96xf32, #tpu.memory_space<vmem>>, vector<1x18x96xf32>,
    return
  }
  func.func @transform_0(%arg0: i32, %arg1: i32) -> (i32, i32, i32) {
    %c0_i32 = arith.constant 0 : i32
    %c0_i32_0 = arith.constant 0 : i32
    return %arg0, %arg1, %c0_i32 : i32, i32, i32
  }
  func.func @transform_1(%arg0: i32, %arg1: i32) -> (i32, i32, i32) {
    %c0_i32 = arith.constant 0 : i32
    %c0_i32_0 = arith.constant 0 : i32
    %c0_i32_1 = arith.constant 0 : i32
    return %arg1, %c0_i32, %c0_i32_0 : i32, i32, i32
  }
  func.func @transform_2(%arg0: i32, %arg1: i32) -> (i32, i32, i32) {
    %c0_i32 = arith.constant 0 : i32
    %c0_i32_0 = arith.constant 0 : i32
    %c0_i32_1 = arith.constant 0 : i32
    return %arg0, %c0_i32, %c0_i32_0 : i32, i32, i32
  }
}

</mosaic_0001>

<bundles_post_ra>
// kernel: tpu_custom_call.1
= control target key start
LH: loop header
LB: loop body
LE: loop exit
PB: predicated region body
PF: predicated region fallthrough
CT: control target
= control target key end

     0   :  { %s450_s9 = smov 0   ;;  %s452_s10 = smov 0   ;;  %s493_s0 = inlined_call_operand.vmem [shape: bf16[2,4,96], index: 0, kind: input, shape index: {}]   ;;  %s494_s1 = inlined_call_operand.vmem [shape: bf16[1,18,4], index: 1, kind: input, shape index: {}]   ;;  %s495_s2 = inlined_call_operand.vmem [shape: f32[2,18,96], index: 2, kind: output, shape index: {}]  }
   0x1   :  { %s454_s11 = smov 0  }
   0x2 LB: > { %s24_s12 = sadd.s32 1, %s428_s10  ;;  %p363_p0 = scmp.ge.s32.totalorder %s432_s11, 1  ;;  %s432_s11 = sphi %s454_s11, %s12_s11   ;;  %s428_s10 = sphi %s452_s10, %s497_s10   ;;  %s424_s9 = sphi %s450_s9, %s496_s9  }
   0x3   : > { %p26_p1 = scmp.ge.s32.totalorder %s24_s12, 2  ;;  %p138_p2 = scmp.lt.s32.totalorder %s432_s11, 3 }
   0x5   : > { %s499_s12 = smov (%p26_p1, %s24_s12), 0  ;;  %p139_p3 = pnand %p363_p0, %p138_p2 }
   0x6   : > { %p167_p4 = scmp.lt.s32.totalorder (!%p139_p3), %s424_s9, 1  ;;  %v408_v0 = vld [vmem:[%s494_s1] sm:$0xff] (!%p139_p3)   ;;  %vm209_vm0 = vcmask (!%p139_p3), 31744   ;;  %vm216_vm1 = vcmask (!%p139_p3), 1041408   ;;  %vm192_vm2 = vcmask (!%p139_p3), 779264   ;;  %v434_v4 = vmov (!%p139_p3), 0.0  }
   0x7   : > { %142 = sbr.rel (%p139_p3) target bundleno = 240 (0xf0), region = 28  ;;  %377 = vmatprep.mubr.msk.bf16.mxu0 (!%p139_p3), %vm209_vm0, %v408_v0  ;;  %v409_v3 = vld [vmem:[%s494_s1 + $0x8] ss:$0 sps:$4 sm:$0x11] (!%p139_p3)   ;;  %vm189_vm3 = vcmask (!%p139_p3), 785408  }
   0xe   : > { %s501_s9 = smov (!%p167_p4, %s424_s9), 1 }
   0xf   : > { %s364_s15 = sshll.u32 %s501_s9, 1  ;;  %s382_s16 = smul.u32 24, %s501_s9 }
  0x10   : > { %s173_s19 = scalar_lea.vmem %s493_s0, %s364_s15 }
  0x11   : > { %s183_s22 = scalar_lea.vmem %s495_s2, %s382_s16  ;;  %v200_v1 = vld [vmem:[%s173_s19] sm:$0x3] }
  0x12   : > { %381 = vmatprep.subr.msk.bf16.mxu0 %vm216_vm1, %v200_v1  ;;  %v218_v2 = vsel %vm216_vm1, %v200_v1, 0  ;;  %193 = vst.msk [vmem:[%s183_s22 + $0x10] sm:$0x3] %vm192_vm2, %v434_v4 }
  0x13   : > { %376 = vmatpush3.bf16.msra.mxu0 %v218_v2  ;;  %190 = vst.msk [vmem:[%s183_s22] sm:$0xff] %vm189_vm3, %v434_v4  ;;  %191 = vst.msk [vmem:[%s183_s22 + $0x8] sm:$0xff] %vm189_vm3, %v434_v4 }
  0x16   : > { %378 = vmatmul.mubr.msk.bf16.vlgmr.msra.gmra.mrb[0].mxu0 %vm209_vm0, %v409_v3 }
  0x19   : > { %v196_v5 = vld [vmem:[%s183_s22 + $0x10] sm:$0x3] }
  0x1a   : > { %v194_v6 = vld [vmem:[%s183_s22] sm:$0xff]  ;;  %v195_v10 = vld [vmem:[%s183_s22 + $0x8] sm:$0xff] }
  0xe9   : > { %v379_v7 = vpop.f32.mrb[0].mxu0 }
  0xea   : > { %v270_v8 = vadd.f32 %v379_v7, %v196_v5  ;;  %v254_v9 = vpop.f32.mrb[1].mxu0 }
  0xeb   : > { %v268_v11 = vadd.f32 %v254_v9, %v194_v6  ;;  %v380_v12 = vpop.f32.mrb[2].mxu0 }
  0xec   : > { %275 = vst.msk [vmem:[%s183_s22 + $0x10] sm:$0x3] %vm192_vm2, %v270_v8  ;;  %v257_v13 = vpop.f32.mrb[3].mxu0 }
  0xed   : > { %272 = vst.msk [vmem:[%s183_s22] sm:$0xff] %vm189_vm3, %v268_v11  ;;  %v269_v14 = vadd.f32 %v257_v13, %v195_v10 }
  0xef   : > { %273 = vst.msk [vmem:[%s183_s22 + $0x8] sm:$0xff] %vm189_vm3, %v269_v14 }
  0xf0 PF: > { %s12_s11 = sadd.s32 1, %s432_s11   ;;  %s496_s9 = smov %s428_s10 }
  0xf1   : > { %p9_p5 = scmp.ge.s32.totalorder %s12_s11, 4   ;;  %s497_s10 = smov %s499_s12 }
  0xf3   :  { %11 = sbr.rel (!%p9_p5) target bundleno = 2 (0x2), region = 65 }

</bundles_post_ra>
